<compile_context>
chip_gen: v7x
topology: tpu7x:2x2x1
jax: 0.10.0
libtpu: 0.0.40
codegen_flags: <defaults>
</compile_context>

<pallas_src>
import jax
import jax.numpy as jnp
from jax import lax
from jax.experimental import pallas as pl
from jax.experimental.pallas import tpu as pltpu


def attention_kernel(w_ref, hsrc_ref, htgt_ref, out_ref):
    """One grid step handles TB batch elements.

    w_ref:    (H, H)            nn.Linear weight (out, in), no bias
    hsrc_ref: (TB, S_src, H)    source hidden states
    htgt_ref: (TB, S_tgt, H)    target hidden states
    out_ref:  (TB, S_tgt, H)    context vectors
    """
    h_src = hsrc_ref[...]                       # (TB, S_src, H)
    h_tgt = htgt_ref[...]                       # (TB, S_tgt, H)
    w = w_ref[...]                              # (H, H)

    tb, s_tgt, h = h_tgt.shape

    # query = h_tgt @ W.T  -- flattened to one MXU-sized matmul, contracting W's dim 1
    # (no transpose materialized).
    query2 = lax.dot_general(
        h_tgt.reshape(tb * s_tgt, h), w,
        dimension_numbers=(((1,), (1,)), ((), ())),
        preferred_element_type=jnp.float32,
    )                                           # (TB*S_tgt, H)
    query = query2.reshape(tb, s_tgt, h)        # (TB, S_tgt, H), f32

    # scores[b, t, s] = sum_o query[b, t, o] * h_src[b, s, o]   (no h_src.T copy)
    scores = jnp.einsum(
        "bto,bso->bts", query, h_src,
        preferred_element_type=jnp.float32,
    )                                           # (TB, S_tgt, S_src), f32

    # Numerically stable softmax over S_src, kept in f32 (v5e VPU/EUP have no bf16).
    m = jnp.max(scores, axis=-1, keepdims=True)
    e = jnp.exp(scores - m)                     # (TB, S_tgt, S_src)
    denom = jnp.sum(e, axis=-1, keepdims=True)  # (TB, S_tgt, 1)

    # context = (e @ h_src) * (1/denom): fold the per-row normalization after the
    # matmul so the elementwise scale acts on the (TB, S_tgt, H) tile only.
    ctx = jnp.einsum(
        "bts,bsh->bth", e, h_src,
        preferred_element_type=jnp.float32,
    )                                           # (TB, S_tgt, H), f32
    inv = pl.reciprocal(denom, approx=False)    # exact, to preserve reference-level accuracy
    out_ref[...] = (ctx * inv).astype(out_ref.dtype)


def _choose_block_b(B, S_src, S_tgt, H, itemsize, vmem_budget=24 * 1024 * 1024):
    """Largest divisor of B whose double-buffered working set fits the VMEM budget."""
    best = 1
    for tb in range(1, B + 1):
        if B % tb:
            continue
        # double-buffered input/output blocks
        io_bytes = 2 * tb * (S_src * H + 2 * S_tgt * H) * itemsize + 2 * H * H * itemsize
        # f32 intermediates: query + ctx + scores + exp(scores)
        interm_bytes = tb * (2 * S_tgt * H + 2 * S_tgt * S_src) * 4
        if io_bytes + interm_bytes <= vmem_budget:
            best = tb
        if tb * S_tgt >= 1024:   # block is already MXU-saturating; keep pipeline depth
            break
    return best


def attention_forward(w, h_src, h_t_tgt, *, block_b=None):
    """w: (H, H); h_src: (B, S_src, H); h_t_tgt: (B, S_tgt, H) -> (B, S_tgt, H)."""
    B, S_src, H = h_src.shape
    Bt, S_tgt, Ht = h_t_tgt.shape
    assert Bt == B and Ht == H and w.shape == (H, H)

    itemsize = jnp.dtype(h_src.dtype).itemsize
    if block_b is None:
        block_b = _choose_block_b(B, S_src, S_tgt, H, itemsize)
    assert B % block_b == 0

    flops = 2 * B * S_tgt * H * (H + 2 * S_src)
    transcendentals = B * S_tgt * S_src
    bytes_accessed = (
        (H * H + B * S_src * H + B * S_tgt * H) * itemsize
        + B * S_tgt * H * jnp.dtype(h_t_tgt.dtype).itemsize
    )

    return pl.pallas_call(
        attention_kernel,
        out_shape=jax.ShapeDtypeStruct((B, S_tgt, H), h_t_tgt.dtype),
        grid_spec=pltpu.PrefetchScalarGridSpec(
            num_scalar_prefetch=0,
            grid=(B // block_b,),
            in_specs=[
                pl.BlockSpec((H, H), lambda b: (0, 0)),                 # weight, shared
                pl.BlockSpec((block_b, S_src, H), lambda b: (b, 0, 0)),
                pl.BlockSpec((block_b, S_tgt, H), lambda b: (b, 0, 0)),
            ],
            out_specs=pl.BlockSpec((block_b, S_tgt, H), lambda b: (b, 0, 0)),
        ),
        compiler_params=pltpu.CompilerParams(
            dimension_semantics=("parallel",),        # shard batch blocks across TCs (v7x)
            vmem_limit_bytes=64 * 1024 * 1024,        # safe on v5e/v6e/v7x; blocks sized to ~24 MiB
        ),
        cost_estimate=pl.CostEstimate(
            flops=flops,
            transcendentals=transcendentals,
            bytes_accessed=bytes_accessed,
        ),
    )(w, h_src, h_t_tgt)


def attention_reference(w, h_src, h_t_tgt):
    """Pure-JAX reference mirroring the PyTorch forward (mask is a no-op per spec)."""
    query = jnp.einsum("bth,oh->bto", h_t_tgt, w)          # Linear, no bias
    scores = jnp.einsum("bto,bso->bts", query, h_src)      # bmm(query, h_src^T)
    weights = jax.nn.softmax(scores, axis=-1)
    return jnp.einsum("bts,bsh->bth", weights, h_src)      # bmm(weights, h_src)


if __name__ == "__main__":
    B, S_SRC, S_TGT, H = 2, 8, 8, 32

    key = jax.random.PRNGKey(0)
    k_w, k_src, k_tgt = jax.random.split(key, 3)

    # Deterministic "parameter" init (nn.Linear(hidden_size, hidden_size, bias=False))
    w = jax.random.normal(k_w, (H, H), dtype=jnp.float32) * (1.0 / jnp.sqrt(H))
    h_src = jax.random.normal(k_src, (B, S_SRC, H), dtype=jnp.float32)
    h_t_tgt = jax.random.normal(k_tgt, (B, S_TGT, H), dtype=jnp.float32)

    out = attention_forward(w, h_src, h_t_tgt)
    out = jax.block_until_ready(out)

    ref = attention_reference(w, h_src, h_t_tgt)
    assert out.shape == (B, S_TGT, H)
    assert jnp.allclose(out, ref, atol=1e-5, rtol=1e-5), "mismatch vs reference"

    print("KERNEL_OK")
</pallas_src>

<mosaic_0001>
module attributes {stable_mosaic.version = 11 : i64} {
  func.func @attention_kernel(%arg0: i32, %arg1: memref<32x32xf32, #tpu.memory_space<vmem>>, %arg2: memref<2x8x32xf32, #tpu.memory_space<vmem>>, %arg3: memref<2x8x32xf32, #tpu.memory_space<vmem>>, %arg4: memref<2x8x32xf32, #tpu.memory_space<vmem>>) attributes {dimension_semantics = [#tpu.dimension_semantics<parallel>], iteration_bounds = array<i64: 1>, scalar_prefetch = 0 : i64, scratch_operands = 0 : i64, tpu.core_type = #tpu.core_type<tc>, window_params = [{pipeline_mode = #tpu.pipeline_mode<synchronous>, transform_indices = @transform_0, window_bounds = array<i64: 32, 32>}, {transform_indices = @transform_1, window_bounds = array<i64: 2, 8, 32>}, {transform_indices = @transform_2, window_bounds = array<i64: 2, 8, 32>}, {transform_indices = @transform_3, window_bounds = array<i64: 2, 8, 32>}]} {
    %c0 = arith.constant 0 : index
    %c0_0 = arith.constant 0 : index
    %c0_1 = arith.constant 0 : index
    %0 = vector.load %arg2[%c0, %c0_0, %c0_1] : memref<2x8x32xf32, #tpu.memory_space<vmem>>, vector<2x8x32xf32>
    %c0_2 = arith.constant 0 : index
    %c0_3 = arith.constant 0 : index
    %c0_4 = arith.constant 0 : index
    %1 = vector.load %arg3[%c0_2, %c0_3, %c0_4] : memref<2x8x32xf32, #tpu.memory_space<vmem>>, vector<2x8x32xf32>
    %c0_5 = arith.constant 0 : index
    %c0_6 = arith.constant 0 : index
    %2 = vector.load %arg1[%c0_5, %c0_6] : memref<32x32xf32, #tpu.memory_space<vmem>>, vector<32x32xf32>
    %3 = vector.shape_cast %1 : vector<2x8x32xf32> to vector<16x32xf32>
    %cst = arith.constant dense<0.000000e+00> : vector<16x32xf32>
    %4 = tpu.matmul %3, %2, %cst {dimension_numbers = #tpu.dot_dimension_numbers<[1], [1], [0], [0], [0, 0, 1, 0], [], []>} : vector<16x32xf32>, vector<32x32xf32>, vector<16x32xf32> -> vector<16x32xf32>
    %5 = vector.shape_cast %4 : vector<16x32xf32> to vector<2x8x32xf32>
    "tpu.trace_start"() <{level = 10 : i32, message = "bto,bso->bts"}> : () -> ()
    %cst_7 = arith.constant dense<0.000000e+00> : vector<2x8x8xf32>
    %6 = tpu.matmul %5, %0, %cst_7 {dimension_numbers = #tpu.dot_dimension_numbers<[2], [2], [1], [1], [0, 0, 0, 1, 1, 1], [0], [0]>} : vector<2x8x32xf32>, vector<2x8x32xf32>, vector<2x8x8xf32> -> vector<2x8x8xf32>
    "tpu.trace_stop"() : () -> ()
    %cst_8 = arith.constant dense<0xFF800000> : vector<2x8xf32>
    %7 = vector.multi_reduction <maximumf>, %6, %cst_8 [2] : vector<2x8x8xf32> to vector<2x8xf32>
    %8 = vector.shape_cast %7 : vector<2x8xf32> to vector<2x8x1xf32>
    %9 = vector.broadcast %8 : vector<2x8x1xf32> to vector<2x8x8xf32>
    %10 = arith.subf %6, %9 : vector<2x8x8xf32>
    %11 = math.exp %10 : vector<2x8x8xf32>
    %cst_9 = arith.constant dense<0.000000e+00> : vector<2x8xf32>
    %12 = vector.multi_reduction <add>, %11, %cst_9 [2] : vector<2x8x8xf32> to vector<2x8xf32>
    %13 = vector.shape_cast %12 : vector<2x8xf32> to vector<2x8x1xf32>
    "tpu.trace_start"() <{level = 10 : i32, message = "bts,bsh->bth"}> : () -> ()
    %cst_10 = arith.constant dense<0.000000e+00> : vector<2x8x32xf32>
    %14 = tpu.matmul %11, %0, %cst_10 {dimension_numbers = #tpu.dot_dimension_numbers<[2], [1], [1], [2], [0, 0, 0, 1, 1, 2], [0], [0]>} : vector<2x8x8xf32>, vector<2x8x32xf32>, vector<2x8x32xf32> -> vector<2x8x32xf32>
    "tpu.trace_stop"() : () -> ()
    %15 = tpu.reciprocal %13 : vector<2x8x1xf32> -> vector<2x8x1xf32>
    %16 = vector.broadcast %15 : vector<2x8x1xf32> to vector<2x8x32xf32>
    %17 = arith.mulf %14, %16 : vector<2x8x32xf32>
    %c0_11 = arith.constant 0 : index
    %c0_12 = arith.constant 0 : index
    %c0_13 = arith.constant 0 : index
    %18 = vector.load %arg4[%c0_11, %c0_12, %c0_13] : memref<2x8x32xf32, #tpu.memory_space<vmem>>, vector<2x8x32xf32>
    tpu.vector_store %arg4[%c0_11, %c0_12, %c0_13], %17 {strides = array<i32>} : memref<2x8x32xf32, #tpu.memory_space<vmem>>, vector<2x8x32xf32>,
    return
  }
  func.func @transform_0(%arg0: i32) -> (i32, i32) {
    %c0_i32 = arith.constant 0 : i32
    %c0_i32_0 = arith.constant 0 : i32
    %c0_i32_1 = arith.constant 0 : i32
    return %c0_i32, %c0_i32_0 : i32, i32
  }
  func.func @transform_1(%arg0: i32) -> (i32, i32, i32) {
    %c0_i32 = arith.constant 0 : i32
    %c0_i32_0 = arith.constant 0 : i32
    %c0_i32_1 = arith.constant 0 : i32
    return %arg0, %c0_i32, %c0_i32_0 : i32, i32, i32
  }
  func.func @transform_2(%arg0: i32) -> (i32, i32, i32) {
    %c0_i32 = arith.constant 0 : i32
    %c0_i32_0 = arith.constant 0 : i32
    %c0_i32_1 = arith.constant 0 : i32
    return %arg0, %c0_i32, %c0_i32_0 : i32, i32, i32
  }
  func.func @transform_3(%arg0: i32) -> (i32, i32, i32) {
    %c0_i32 = arith.constant 0 : i32
    %c0_i32_0 = arith.constant 0 : i32
    %c0_i32_1 = arith.constant 0 : i32
    return %arg0, %c0_i32, %c0_i32_0 : i32, i32, i32
  }
}

</mosaic_0001>

<bundles_post_ra>
// kernel: tpu_custom_call.1
= control target key start
LH: loop header
LB: loop body
LE: loop exit
PB: predicated region body
PF: predicated region fallthrough
CT: control target
= control target key end

     0   :  { %8 = vsyncpa [#allocation3], 0  ;;  %s793_s0 = inlined_call_operand.hbm [shape: f32[32,32], index: 0, kind: input, shape index: {}]   ;;  %s794_s1 = inlined_call_operand.hbm [shape: f32[2,8,32], index: 1, kind: input, shape index: {}]   ;;  %s795_s2 = inlined_call_operand.hbm [shape: f32[2,8,32], index: 2, kind: input, shape index: {}]   ;;  %s796_s3 = inlined_call_operand.hbm [shape: f32[2,8,32], index: 3, kind: output, shape index: {}]  }
   0x1   :  { %9 = vsyncpa [#allocation6], 0 }
   0x2   :  { %10 = vsyncpa [#allocation4], 0  ;;  %s678_s12 = smov [#allocation5]   ;;  %s679_s14 = smov [#allocation2]  }
   0x3   :  { %s28_s13 = sshll.u32 %s678_s12, 4  ;;  %s16_s15 = sshll.u32 %s679_s14, 4  ;;  %s29_s13 = int_to_ptr.vmem [resolvable:$true] %s28_s13  ;;  %s706_s15 = int_to_ptr.vmem [resolvable:$true] %s16_s15 }
   0x4   :  { %s584_s18 = scalar_lea.hbm %s794_s1, 256 }
   0x5   :  { %p585_p0 = scmp.ne.s32.totalorder %s794_s1, %s584_s18  ;;  %p588_p1 = scmp.lt.u32.totalorder %s584_s18, %s794_s1 }
   0x7   :  { %p590_p2 = pnand %p588_p1, %p585_p0 }
   0x9   :  { %593 = shalt.err (!%p590_p2)
}
   0xa   :  { %s594_s23 = scalar_lea.vmem %s29_s13, 256  ;;  %p599_p4 = scmp.lt.s32.totalorder %s29_s13, %s29_s13 }
   0xb   :  { %p595_p3 = scmp.ne.s32.totalorder %s29_s13, %s594_s23  ;;  %p600_p5 = scmp.lt.s32.totalorder %s594_s23, %s594_s23 }
   0xd   :  { %p601_p6 = por %p600_p5, %p599_p4 }
   0xf   :  { %p602_p7 = pnand %p601_p6, %p595_p3 }
  0x11   :  { %605 = shalt.err (!%p602_p7)
}
  0x12   :  { %s680_s24 = smov 128   ;;  %s681_s25 = smov 8  }
  0x13   :  { %34 = dma.hbm_to_vmem [thread:$0]  %s794_s1, 256, %s29_s13, [#allocation6], %s680_s24, %s680_s24, %s681_s25  }
  0x14   :  { %s606_s30 = scalar_lea.hbm %s793_s0, 512 }
  0x15   :  { %p607_p8 = scmp.ne.s32.totalorder %s793_s0, %s606_s30  ;;  %p610_p9 = scmp.lt.u32.totalorder %s606_s30, %s793_s0 }
  0x17   :  { %p612_p10 = pnand %p610_p9, %p607_p8 }
  0x19   :  { %615 = shalt.err (!%p612_p10)
}
  0x1a   :  { %s616_s8 = scalar_lea.vmem %s706_s15, 512  ;;  %p621_p12 = scmp.lt.s32.totalorder %s706_s15, %s706_s15 }
  0x1b   :  { %p617_p11 = scmp.ne.s32.totalorder %s706_s15, %s616_s8  ;;  %p622_p13 = scmp.lt.s32.totalorder %s616_s8, %s616_s8 }
  0x1d   :  { %p623_p0 = por %p622_p13, %p621_p12 }
  0x1f   :  { %p624_p1 = pnand %p623_p0, %p617_p11 }
  0x21   :  { %627 = shalt.err (!%p624_p1)
}
  0x22   :  { %22 = dma.hbm_to_vmem [thread:$0]  %s793_s0, 512, %s706_s15, [#allocation3], %s680_s24, %s680_s24, %s681_s25  }
  0x23   :  { %s682_s10 = smov [#allocation7]   ;;  %s628_s14 = scalar_lea.hbm %s795_s2, 256 }
  0x24   :  { %s40_s11 = sshll.u32 %s682_s10, 4  ;;  %p629_p2 = scmp.ne.s32.totalorder %s795_s2, %s628_s14  ;;  %s41_s11 = int_to_ptr.vmem [resolvable:$true] %s40_s11 }
  0x25   :  { %p632_p3 = scmp.lt.u32.totalorder %s628_s14, %s795_s2 }
  0x27   :  { %p634_p4 = pnand %p632_p3, %p629_p2 }
  0x29   :  { %637 = shalt.err (!%p634_p4)
}
  0x2a   :  { %s638_s20 = scalar_lea.vmem %s41_s11, 256  ;;  %p643_p6 = scmp.lt.s32.totalorder %s41_s11, %s41_s11 }
  0x2b   :  { %p639_p5 = scmp.ne.s32.totalorder %s41_s11, %s638_s20  ;;  %p644_p7 = scmp.lt.s32.totalorder %s638_s20, %s638_s20 }
  0x2d   :  { %p645_p8 = por %p644_p7, %p643_p6 }
  0x2f   :  { %p646_p9 = pnand %p645_p8, %p639_p5 }
  0x31   :  { %649 = shalt.err (!%p646_p9)
}
  0x32   :  { %46 = dma.hbm_to_vmem [thread:$0]  %s795_s2, 256, %s41_s11, [#allocation6], %s680_s24, %s680_s24, %s681_s25  }
  0x33   :  { %672 = dma.done.wait [#allocation3], 512  }
  0x34   :  { %673 = vsyncadd [#allocation3], 4294966784 }
  0x35   :  { %674 = dma.done.wait [#allocation6], 512  }
  0x36   :  { %675 = vsyncadd [#allocation6], 4294966784  ;;  %v683_v0 = vmov 0.0   ;;  %vm64_vm0 = vcmask 261120   ;;  %v60_v1 = vld [vmem:[#allocation2] sm:$0xff]  ;;  %v61_v2 = vld [vmem:[#allocation2 + $0x8] sm:$0xff] }
  0x37   :  { %536 = vmatprep.subr.mxu1 %v683_v0  ;;  %vm557_vm1 = vmpackc.low %vm64_vm0, %vm64_vm0  ;;  %v62_v3 = vld [vmem:[#allocation2 + $0x10] sm:$0xff]  ;;  %v556_v4 = vpack.c.bf16 %v61_v2, %v60_v1  ;;  %v63_v5 = vld [vmem:[#allocation2 + $0x18] sm:$0xff]  ;;  %vm684_vm2 = vmmov 0   ;;  %vm310_vm3 = vcmask 64512   ;;  %s685_s2 = smov [#allocation8]  }
  0x38   :  { %v58_v6 = vld [vmem:[#allocation7] sm:$0xff]  ;;  %v562_v7 = vpack.c.bf16 %v63_v5, %v62_v3  ;;  %v56_v8 = vld [vmem:[#allocation5] sm:$0xff]  ;;  %v59_v9 = vld [vmem:[#allocation7 + $0x8] sm:$0xff]  ;;  %538 = vmatprep.mubr.msk.f32.mxu1 %vm684_vm2, %v683_v0  ;;  %s486_s21 = sshll.u32 %s685_s2, 4  ;;  %s487_s21 = int_to_ptr.vmem [resolvable:$true] %s486_s21 }
  0x39   :  { %533 = vmatprep.mubr.msk.f32.mxu0 %vm64_vm0, %v58_v6  ;;  %558 = vmatprep.subr.msk.bf16.mxu0 %vm557_vm1, %v556_v4  ;;  %v57_v11 = vld [vmem:[#allocation5 + $0x8] sm:$0xff]  ;;  %s650_s22 = scalar_lea.vmem %s487_s21, 256  ;;  %p655_p11 = scmp.lt.s32.totalorder %s487_s21, %s487_s21 }
  0x3a   :  { %537 = vmatpush3.xpose.msk.msra.mxu1 %vm64_vm0, %v56_v8  ;;  %561 = vmatpush3.bf16.xpose.msk.msra.mxu0 %vm557_vm1, %v556_v4  ;;  %p651_p10 = scmp.ne.s32.totalorder %s487_s21, %s650_s22  ;;  %p656_p12 = scmp.lt.s32.totalorder %s650_s22, %s650_s22 }
  0x3b   :  { %541 = vmatprep.subr.mxu1 %v683_v0  ;;  %564 = vmatprep.subr.msk.bf16.mxu0 %vm557_vm1, %v562_v7 }
  0x3c   :  { %p657_p13 = por %p656_p12, %p655_p11 }
  0x3e   :  { %p658_p0 = pnand %p657_p13, %p651_p10 }
  0x42   :  { %567 = vmatpush3.bf16.xpose.msk.msra.mxu0 %vm557_vm1, %v562_v7 }
  0x49   :  { %534 = vmatmul.mubr.msk.f32.vlgmr.msra.gmra.mrb[0].mxu0 %vm64_vm0, %v59_v9 }
 0x11c   :  { %v535_v10 = vpop.f32.mrb[0].mxu0 }
 0x11d   :  { %v149_v12 = vpop.f32.mrb[1].mxu0 }
 0x11e   :  { %539 = vmatmul.mubr.msk.f32.vlgmr.msra.gmra.mrb[0].mxu1 %vm64_vm0, %v149_v12 }
 0x11f   :  { %542 = vmatpush3.xpose.msk.msra.mxu1 %vm64_vm0, %v57_v11  ;;  %543 = vmatprep.mubr.msk.f32.mxu1 %vm684_vm2, %v683_v0 }
 0x120   :  { %546 = vmatprep.subr.mxu1 %v683_v0 }
 0x122   :  { %544 = vmatmul.mubr.msk.f32.vlgmr.msra.gmra.mrb[2].mxu1 %vm64_vm0, %v535_v10 }
 0x123   :  { %547 = vmatpush3.msra.mxu1 %v56_v8  ;;  %548 = vmatprep.mubr.msk.f32.mxu1 %vm684_vm2, %v683_v0 }
 0x124   :  { %551 = vmatprep.subr.mxu1 %v683_v0 }
 0x1f1   :  { %v230_v13 = vpop.f32.mrb[0].mxu1 }
 0x1f2   :  { %v540_v14 = vpop.f32.mrb[1].mxu1  ;;  %v311_v15 = vsel %vm310_vm3, %v230_v13, -inf }
 0x1f3   :  { %312 = vmax.xlane.f32.xlu0 %v311_v15 }
 0x1f5   :  { %v306_v16 = vpop.f32.mrb[2].mxu1 }
 0x1f6   :  { %v545_v17 = vpop.f32.mrb[3].mxu1  ;;  %v314_v18 = vsel %vm310_vm3, %v306_v16, -inf }
 0x1f7   :  { %315 = vmax.xlane.f32.xlu0 %v314_v18 }
 0x280   :  { %v313_v19 = vpop.xlane.xlu0 %312 }
 0x281   :  { %v317_v20 = vsub.f32 %v230_v13, %v313_v19 }
 0x283   :  { %v319_v21 = vmul.f32 1.442695, %v317_v20 }
 0x284   :  { %v316_v22 = vpop.xlane.xlu0 %315 }
 0x285   :  { %576 = vpow2.f32 %v319_v21  ;;  %v318_v23 = vsub.f32 %v306_v16, %v316_v22 }
 0x287   :  { %v321_v24 = vmul.f32 1.442695, %v318_v23 }
 0x289   :  { %578 = vpow2.f32 %v321_v24 }
 0x28f   :  { %v577_v25 = vpop.eup %576 }
 0x290   :  { %549 = vmatmul.mubr.msk.f32.vlgmr.msra.gmra.mrb[4].mxu1 %vm310_vm3, %v577_v25  ;;  %v323_v26 = vsel %vm310_vm3, %v577_v25, 0.0 }
 0x291   :  { %552 = vmatpush3.msra.mxu1 %v57_v11  ;;  %324 = vadd.xlane.f32.xlu1 %v323_v26 }
 0x292   :  { %553 = vmatprep.mubr.msk.f32.mxu1 %vm684_vm2, %v683_v0 }
 0x293   :  { %v579_v27 = vpop.eup %578 }
 0x294   :  { %554 = vmatmul.mubr.msk.f32.vlgmr.msra.gmra.mrb[6].mxu1 %vm310_vm3, %v579_v27  ;;  %v326_v28 = vsel %vm310_vm3, %v579_v27, 0.0 }
 0x295   :  { %327 = vadd.xlane.f32.xlu1 %v326_v28 }
 0x31e   :  { %v325_v29 = vpop.xlane.xlu1 %324 }
 0x31f   :  { %580 = vrcp.f32 %v325_v29 }
 0x322   :  { %v328_v30 = vpop.xlane.xlu1 %327 }
 0x323   :  { %582 = vrcp.f32 %v328_v30 }
 0x329   :  { %v581_v31 = vpop.eup %580 }
 0x32d   :  { %v583_v35 = vpop.eup %582 }
 0x363   :  { %v398_v32 = vpop.f32.mrb[4].mxu1 }
 0x364   :  { %v477_v33 = vmul.f32 %v581_v31, %v398_v32  ;;  %v550_v34 = vpop.f32.mrb[5].mxu1 }
 0x366   :  { %479 = vst.msk [vmem:[#allocation8] sm:$0xff] %vm64_vm0, %v477_v33 }
 0x367   :  { %v471_v36 = vpop.f32.mrb[6].mxu1 }
 0x368   :  { %v478_v37 = vmul.f32 %v583_v35, %v471_v36  ;;  %v555_v38 = vpop.f32.mrb[7].mxu1 }
 0x36a   :  { %480 = vst.msk [vmem:[#allocation8 + $0x8] sm:$0xff] %vm64_vm0, %v478_v37 }
 0x36b   :  { %661 = shalt.err (!%p658_p0)
}
 0x36c   :  { %s662_s27 = scalar_lea.hbm %s796_s3, 256 }
 0x36d   :  { %p663_p1 = scmp.ne.s32.totalorder %s796_s3, %s662_s27  ;;  %p666_p2 = scmp.lt.u32.totalorder %s662_s27, %s796_s3 }
 0x36f   :  { %p668_p3 = pnand %p666_p2, %p663_p1 }
 0x371   :  { %671 = shalt.err (!%p668_p3)
}
 0x372   :  { %492 = dma.vmem_to_hbm [thread:$0]  %s487_s21, 256, %s796_s3, [#allocation4], %s680_s24, %s680_s24, %s681_s25  }
 0x373   :  { %676 = dma.done.wait [#allocation4], 256  }
 0x374   :  { %677 = vsyncadd [#allocation4], 4294967040 }
 0x375   :  { %496 = vsyncpa [#allocation3], 1 }
 0x376   :  { %497 = vsyncpa [#allocation6], 1 }
 0x377   :  { %498 = vsyncpa [#allocation4], 1 }

</bundles_post_ra>
